<compile_context>
chip_gen: v6e
topology: v6e:2x2x1
jax: 0.10.0
libtpu: 0.0.40
codegen_flags: <defaults>
</compile_context>

<pallas_src>
import jax
import jax.numpy as jnp
import numpy as np
from jax.experimental import pallas as pl
from jax.experimental.pallas import tpu as pltpu

MASK_VALUE = -1.0
LN_EPS = 1e-6  # LayerNorm: g * (x - mean) / (std_unbiased + eps) + b


def _bgs_kernel(x_ref, w_ref, scal_ref, o_ref):
    # x_ref: (GB, L, D) block of groups; w_ref: (2, D) effective weight halves
    # (ln_gain * mlp_w); scal_ref (SMEM, (3,)): [Sx, Sg, b_eff].
    _, L, D = x_ref.shape
    x = x_ref[...]                                     # (GB, L, D), input dtype

    mask = x == MASK_VALUE                             # exact compare (also exact in bf16)
    row_mask = x[:, :, 0] == MASK_VALUE                # (GB, L) forward-pass row mask

    xm = jnp.where(mask, 0.0, x).astype(jnp.float32)   # masked_fill(mask, 0), f32 math

    # counts = max_len - num_masked - 1 (per feature); leave-one-out group mean.
    counts = jnp.float32(L) - jnp.sum(mask.astype(jnp.float32), axis=1, keepdims=True) - 1.0
    inv_counts = pl.reciprocal(counts, approx=True)                     # (GB, 1, D), EUP
    group = (jnp.sum(xm, axis=1, keepdims=True) - xm) * inv_counts      # (GB, L, D)
    group = jnp.where(mask, 0.0, group)

    # Effective weight halves stay (1, D): Mosaic broadcasts them lane-resident,
    # no block-sized broadcast temporaries.
    w_x = w_ref[0:1, :]                                # (1, D): ln_gain * mlp_w[:D]
    w_g = w_ref[1:2, :]                                # (1, D): ln_gain * mlp_w[D:]
    s_x = scal_ref[0]                                  # sum(ln_gain * mlp_w[:D])
    s_g = scal_ref[1]                                  # sum(ln_gain * mlp_w[D:])
    b_eff = scal_ref[2]                                # mlp_b + sum(ln_beta * (w[:D]+w[D:]))

    inv_d = jnp.float32(1.0 / D)
    inv_dm1 = jnp.float32(1.0 / (D - 1))
    d_over_dm1 = jnp.float32(D / (D - 1))

    def fused_ln_dot(v, w_eff, s_w):
        # sum_d w_d * LayerNorm(v)_d, with the affine folded into w_eff / b_eff:
        #   = inv_std * (sum(w_eff*v) - mu * sum(w_eff))        [+ const in b_eff]
        mu = jnp.sum(v, axis=-1) * inv_d                          # (GB, L)
        ssq = jnp.sum(v * v, axis=-1)                             # (GB, L)
        var = jnp.maximum(ssq * inv_dm1 - d_over_dm1 * mu * mu, 0.0)   # unbiased
        inv_std = pl.reciprocal(jnp.sqrt(var) + LN_EPS, approx=True)   # EUP
        ws = jnp.sum(v * w_eff, axis=-1)                          # (GB, L)
        return inv_std * (ws - mu * s_w)

    z = fused_ln_dot(xm, w_x, s_x) + fused_ln_dot(group, w_g, s_g) + b_eff
    out = jax.nn.sigmoid(z)                                       # (GB, L)
    o_ref[...] = jnp.where(row_mask, 0.0, out)


# Live block-sized f32-equivalents in the fused body: x, mask, xm, group plus a
# couple of in-flight products / reduce temporaries.
_LIVE_F32_TENSORS = 8


def _vmem_caps():
    """(explicit scoped-VMEM limit, block-sizing budget), generation-aware."""
    cap = None
    try:
        cap = getattr(pltpu.get_tpu_info(), "vmem_capacity_bytes", None)
    except Exception:
        cap = None
    if not cap:
        cap = 64 << 20                          # assume the smallest generation (v7x)
    limit = int(min(cap // 2, 64 << 20))        # 64 MiB on v5e/v6e, 32 MiB on v7x
    budget = limit * 3 // 4                     # headroom for compiler temporaries
    return limit, budget


def _pick_group_block(B, L, D, itemsize, budget):
    """Groups per grid step, accounting for double-buffered input + live temps."""
    lp = ((L + 7) // 8) * 8                     # sublane padding
    dp = ((D + 127) // 128) * 128               # lane padding for narrow embeddings
    per_group = lp * dp * (4 * _LIVE_F32_TENSORS + 2 * itemsize)
    gb = max(1, budget // max(per_group, 1))
    if B >= 16:
        gb = min(gb, B // 2)                    # >= 2 grid steps: multi-TC parts can split
    if gb >= B:
        return B
    if gb > 8:
        gb = (gb // 8) * 8                      # sublane-aligned output blocks
    return max(1, gb)


def binary_group_salience(x, ln_gain, ln_beta, mlp_w, mlp_b, *, group_block=None):
    """x: (B, L, D) f32/bf16; ln_gain/ln_beta: (D,); mlp_w: (2D,); mlp_b: scalar."""
    B, L, D = x.shape
    ln_gain = ln_gain.astype(jnp.float32)
    ln_beta = ln_beta.astype(jnp.float32)
    w2 = mlp_w.astype(jnp.float32).reshape(2, D)       # row 0: x half, row 1: group half

    # Fold the LayerNorm affine into the Linear layer (both streams use the
    # same input_layer_norm_ parameters, matching the original module):
    #   sum(w * (g*(v-mu)/(std+eps) + b)) = inv_std*(sum(w*g*v) - mu*sum(w*g)) + sum(w*b)
    w_eff = ln_gain[None, :] * w2                      # (2, D)
    s_eff = jnp.sum(w_eff, axis=1)                     # (2,) -> Sx, Sg
    b_eff = jnp.asarray(mlp_b, jnp.float32) + jnp.sum(ln_beta * (w2[0] + w2[1]))
    scal = jnp.concatenate([s_eff, b_eff.reshape(1)]).astype(jnp.float32)   # (3,) -> SMEM

    vmem_limit, budget = _vmem_caps()
    itemsize = jnp.dtype(x.dtype).itemsize             # bf16 inputs stay bf16 (no upcast copy)
    gb = min(group_block, B) if group_block else _pick_group_block(B, L, D, itemsize, budget)

    # TODO(synk): for production D < 128, pack 128//D groups into the lane axis and
    # move the per-D reductions to a block-diagonal MXU matmul (deferred: needs a
    # relayout that is not free for row-major (B, L, D) inputs).
    out = pl.pallas_call(
        _bgs_kernel,
        out_shape=jax.ShapeDtypeStruct((B, L), jnp.float32),
        grid_spec=pltpu.PrefetchScalarGridSpec(
            num_scalar_prefetch=0,
            grid=(pl.cdiv(B, gb),),                    # no padding copy: ragged last block OK
            in_specs=[
                pl.BlockSpec((gb, L, D), lambda b: (b, 0, 0)),        # batched group block
                pl.BlockSpec((2, D), lambda b: (0, 0)),               # effective weight halves
                pl.BlockSpec(memory_space=pltpu.MemorySpace.SMEM),    # [Sx, Sg, b_eff]
            ],
            out_specs=pl.BlockSpec((gb, L), lambda b: (b, 0)),
        ),
        compiler_params=pltpu.CompilerParams(
            dimension_semantics=("parallel",),
            vmem_limit_bytes=vmem_limit,
        ),
    )(x, w_eff, scal)
    return out


def _reference(x, ln_gain, ln_beta, mlp_w, mlp_b):
    x = x.astype(jnp.float32)
    mask = x == MASK_VALUE
    row_mask = x[:, :, 0] == MASK_VALUE
    xm = jnp.where(mask, 0.0, x)
    L = x.shape[1]
    counts = L - mask.astype(jnp.float32).sum(1) - 1.0
    gm = xm.sum(1) / counts
    grp = gm[:, None, :] - xm / counts[:, None, :]
    grp = jnp.where(mask, 0.0, grp)

    def ln(v):
        mu = v.mean(-1, keepdims=True)
        var = ((v - mu) ** 2).sum(-1, keepdims=True) / (v.shape[-1] - 1)
        return ln_gain * (v - mu) / (jnp.sqrt(var) + LN_EPS) + ln_beta

    cat = jnp.concatenate([ln(xm), ln(grp)], axis=-1)
    z = jnp.einsum("bld,d->bl", cat, mlp_w) + mlp_b
    return jnp.where(row_mask, 0.0, jax.nn.sigmoid(z))


if __name__ == "__main__":
    B, L, D = 4, 8, 32  # num_groups, max_len, emb_size

    key = jax.random.PRNGKey(0)
    kx, kw = jax.random.split(key, 2)

    x = jax.random.normal(kx, (B, L, D), dtype=jnp.float32)
    # Pad (mask) trailing rows of some groups with mask_value = -1.
    x = x.at[0, 6:, :].set(MASK_VALUE)
    x = x.at[1, 7:, :].set(MASK_VALUE)
    x = x.at[2, 5:, :].set(MASK_VALUE)

    # Deterministic synthetic parameters (no checkpoint load).
    ln_gain = 1.0 + 0.01 * jnp.arange(D, dtype=jnp.float32)           # LayerNorm gain
    ln_beta = 0.001 * jnp.arange(D, dtype=jnp.float32)                # LayerNorm bias
    mlp_w = 0.1 * jax.random.normal(kw, (2 * D,), dtype=jnp.float32)  # Linear(2D, 1) weight
    mlp_b = jnp.float32(0.05)

    out = jax.block_until_ready(binary_group_salience(x, ln_gain, ln_beta, mlp_w, mlp_b))

    ref = _reference(x, ln_gain, ln_beta, mlp_w, mlp_b)
    # Tolerance loosened vs 1e-5 because approx (EUP) reciprocals and the
    # sum-of-squares variance were adopted per the performance review.
    np.testing.assert_allclose(np.asarray(out), np.asarray(ref), rtol=5e-3, atol=5e-3)

    print("KERNEL_OK")
</pallas_src>

<mosaic_0001>
module attributes {stable_mosaic.version = 11 : i64} {
  func.func @_bgs_kernel(%arg0: i32, %arg1: memref<4x8x32xf32, #tpu.memory_space<vmem>>, %arg2: memref<2x32xf32, #tpu.memory_space<vmem>>, %arg3: memref<3xf32, #tpu.memory_space<smem>>, %arg4: memref<4x8xf32, #tpu.memory_space<vmem>>) attributes {dimension_semantics = [#tpu.dimension_semantics<parallel>], iteration_bounds = array<i64: 1>, scalar_prefetch = 0 : i64, scratch_operands = 0 : i64, tpu.core_type = #tpu.core_type<tc>, window_params = [{transform_indices = @transform_0, window_bounds = array<i64: 4, 8, 32>}, {pipeline_mode = #tpu.pipeline_mode<synchronous>, transform_indices = @transform_1, window_bounds = array<i64: 2, 32>}, {transform_indices = @transform_2, window_bounds = array<i64: 3>}, {transform_indices = @transform_3, window_bounds = array<i64: 4, 8>}]} {
    %c0 = arith.constant 0 : index
    %c0_0 = arith.constant 0 : index
    %c0_1 = arith.constant 0 : index
    %0 = vector.load %arg1[%c0, %c0_0, %c0_1] : memref<4x8x32xf32, #tpu.memory_space<vmem>>, vector<4x8x32xf32>
    %cst = arith.constant -1.000000e+00 : f32
    %1 = vector.broadcast %cst : f32 to vector<4x8x32xf32>
    %2 = arith.cmpf oeq, %0, %1 : vector<4x8x32xf32>
    %3 = vector.extract_strided_slice %0 {offsets = [0, 0, 0], sizes = [4, 8, 1], strides = [1, 1, 1]} : vector<4x8x32xf32> to vector<4x8x1xf32>
    %4 = vector.shape_cast %3 : vector<4x8x1xf32> to vector<4x8xf32>
    %cst_2 = arith.constant -1.000000e+00 : f32
    %5 = vector.broadcast %cst_2 : f32 to vector<4x8xf32>
    %6 = arith.cmpf oeq, %4, %5 : vector<4x8xf32>
    %cst_3 = arith.constant 0.000000e+00 : f32
    %7 = vector.broadcast %cst_3 : f32 to vector<4x8x32xf32>
    %8 = arith.select %2, %7, %0 : vector<4x8x32xi1>, vector<4x8x32xf32>
    %9 = arith.extui %2 : vector<4x8x32xi1> to vector<4x8x32xi32>
    %10 = arith.sitofp %9 : vector<4x8x32xi32> to vector<4x8x32xf32>
    %cst_4 = arith.constant dense<0.000000e+00> : vector<4x32xf32>
    %11 = vector.multi_reduction <add>, %10, %cst_4 [1] : vector<4x8x32xf32> to vector<4x32xf32>
    %12 = vector.shape_cast %11 : vector<4x32xf32> to vector<4x1x32xf32>
    %cst_5 = arith.constant 8.000000e+00 : f32
    %13 = vector.broadcast %cst_5 : f32 to vector<4x1x32xf32>
    %14 = arith.subf %13, %12 : vector<4x1x32xf32>
    %cst_6 = arith.constant 1.000000e+00 : f32
    %15 = vector.broadcast %cst_6 : f32 to vector<4x1x32xf32>
    %16 = arith.subf %14, %15 : vector<4x1x32xf32>
    %17 = tpu.reciprocal %16 {approx = true} : vector<4x1x32xf32> -> vector<4x1x32xf32>
    %cst_7 = arith.constant dense<0.000000e+00> : vector<4x32xf32>
    %18 = vector.multi_reduction <add>, %8, %cst_7 [1] : vector<4x8x32xf32> to vector<4x32xf32>
    %19 = vector.shape_cast %18 : vector<4x32xf32> to vector<4x1x32xf32>
    %20 = vector.broadcast %19 : vector<4x1x32xf32> to vector<4x8x32xf32>
    %21 = arith.subf %20, %8 : vector<4x8x32xf32>
    %22 = vector.broadcast %17 : vector<4x1x32xf32> to vector<4x8x32xf32>
    %23 = arith.mulf %21, %22 : vector<4x8x32xf32>
    %cst_8 = arith.constant 0.000000e+00 : f32
    %24 = vector.broadcast %cst_8 : f32 to vector<4x8x32xf32>
    %25 = arith.select %2, %24, %23 : vector<4x8x32xi1>, vector<4x8x32xf32>
    %c0_9 = arith.constant 0 : index
    %c0_10 = arith.constant 0 : index
    %26 = vector.load %arg2[%c0_9, %c0_10] : memref<2x32xf32, #tpu.memory_space<vmem>>, vector<1x32xf32>
    %c1 = arith.constant 1 : index
    %c0_11 = arith.constant 0 : index
    %27 = vector.load %arg2[%c1, %c0_11] : memref<2x32xf32, #tpu.memory_space<vmem>>, vector<1x32xf32>
    %c0_12 = arith.constant 0 : index
    %28 = memref.load %arg3[%c0_12] : memref<3xf32, #tpu.memory_space<smem>>
    %c1_13 = arith.constant 1 : index
    %29 = memref.load %arg3[%c1_13] : memref<3xf32, #tpu.memory_space<smem>>
    %c2 = arith.constant 2 : index
    %30 = memref.load %arg3[%c2] : memref<3xf32, #tpu.memory_space<smem>>
    %cst_14 = arith.constant dense<0.000000e+00> : vector<4x8xf32>
    %31 = vector.multi_reduction <add>, %8, %cst_14 [2] : vector<4x8x32xf32> to vector<4x8xf32>
    %cst_15 = arith.constant 3.125000e-02 : f32
    %32 = vector.broadcast %cst_15 : f32 to vector<4x8xf32>
    %33 = arith.mulf %31, %32 : vector<4x8xf32>
    %34 = arith.mulf %8, %8 : vector<4x8x32xf32>
    %cst_16 = arith.constant dense<0.000000e+00> : vector<4x8xf32>
    %35 = vector.multi_reduction <add>, %34, %cst_16 [2] : vector<4x8x32xf32> to vector<4x8xf32>
    %cst_17 = arith.constant 0.0322580636 : f32
    %36 = vector.broadcast %cst_17 : f32 to vector<4x8xf32>
    %37 = arith.mulf %35, %36 : vector<4x8xf32>
    %cst_18 = arith.constant 1.03225803 : f32
    %38 = vector.broadcast %cst_18 : f32 to vector<4x8xf32>
    %39 = arith.mulf %38, %33 : vector<4x8xf32>
    %40 = arith.mulf %39, %33 : vector<4x8xf32>
    %41 = arith.subf %37, %40 : vector<4x8xf32>
    %cst_19 = arith.constant 0.000000e+00 : f32
    %42 = vector.broadcast %cst_19 : f32 to vector<4x8xf32>
    %43 = arith.maximumf %41, %42 : vector<4x8xf32>
    %44 = math.sqrt %43 : vector<4x8xf32>
    %cst_20 = arith.constant 9.99999997E-7 : f32
    %45 = vector.broadcast %cst_20 : f32 to vector<4x8xf32>
    %46 = arith.addf %44, %45 : vector<4x8xf32>
    %47 = tpu.reciprocal %46 {approx = true} : vector<4x8xf32> -> vector<4x8xf32>
    %48 = vector.shape_cast %26 : vector<1x32xf32> to vector<1x1x32xf32>
    %49 = vector.broadcast %48 : vector<1x1x32xf32> to vector<4x8x32xf32>
    %50 = arith.mulf %8, %49 : vector<4x8x32xf32>
    %cst_21 = arith.constant dense<0.000000e+00> : vector<4x8xf32>
    %51 = vector.multi_reduction <add>, %50, %cst_21 [2] : vector<4x8x32xf32> to vector<4x8xf32>
    %52 = vector.broadcast %28 : f32 to vector<4x8xf32>
    %53 = arith.mulf %33, %52 : vector<4x8xf32>
    %54 = arith.subf %51, %53 : vector<4x8xf32>
    %55 = arith.mulf %47, %54 : vector<4x8xf32>
    %cst_22 = arith.constant dense<0.000000e+00> : vector<4x8xf32>
    %56 = vector.multi_reduction <add>, %25, %cst_22 [2] : vector<4x8x32xf32> to vector<4x8xf32>
    %cst_23 = arith.constant 3.125000e-02 : f32
    %57 = vector.broadcast %cst_23 : f32 to vector<4x8xf32>
    %58 = arith.mulf %56, %57 : vector<4x8xf32>
    %59 = arith.mulf %25, %25 : vector<4x8x32xf32>
    %cst_24 = arith.constant dense<0.000000e+00> : vector<4x8xf32>
    %60 = vector.multi_reduction <add>, %59, %cst_24 [2] : vector<4x8x32xf32> to vector<4x8xf32>
    %cst_25 = arith.constant 0.0322580636 : f32
    %61 = vector.broadcast %cst_25 : f32 to vector<4x8xf32>
    %62 = arith.mulf %60, %61 : vector<4x8xf32>
    %cst_26 = arith.constant 1.03225803 : f32
    %63 = vector.broadcast %cst_26 : f32 to vector<4x8xf32>
    %64 = arith.mulf %63, %58 : vector<4x8xf32>
    %65 = arith.mulf %64, %58 : vector<4x8xf32>
    %66 = arith.subf %62, %65 : vector<4x8xf32>
    %cst_27 = arith.constant 0.000000e+00 : f32
    %67 = vector.broadcast %cst_27 : f32 to vector<4x8xf32>
    %68 = arith.maximumf %66, %67 : vector<4x8xf32>
    %69 = math.sqrt %68 : vector<4x8xf32>
    %cst_28 = arith.constant 9.99999997E-7 : f32
    %70 = vector.broadcast %cst_28 : f32 to vector<4x8xf32>
    %71 = arith.addf %69, %70 : vector<4x8xf32>
    %72 = tpu.reciprocal %71 {approx = true} : vector<4x8xf32> -> vector<4x8xf32>
    %73 = vector.shape_cast %27 : vector<1x32xf32> to vector<1x1x32xf32>
    %74 = vector.broadcast %73 : vector<1x1x32xf32> to vector<4x8x32xf32>
    %75 = arith.mulf %25, %74 : vector<4x8x32xf32>
    %cst_29 = arith.constant dense<0.000000e+00> : vector<4x8xf32>
    %76 = vector.multi_reduction <add>, %75, %cst_29 [2] : vector<4x8x32xf32> to vector<4x8xf32>
    %77 = vector.broadcast %29 : f32 to vector<4x8xf32>
    %78 = arith.mulf %58, %77 : vector<4x8xf32>
    %79 = arith.subf %76, %78 : vector<4x8xf32>
    %80 = arith.mulf %72, %79 : vector<4x8xf32>
    %81 = arith.addf %55, %80 : vector<4x8xf32>
    %82 = vector.broadcast %30 : f32 to vector<4x8xf32>
    %83 = arith.addf %81, %82 : vector<4x8xf32>
    %84 = arith.negf %83 : vector<4x8xf32>
    %85 = math.exp %84 : vector<4x8xf32>
    %cst_30 = arith.constant 1.000000e+00 : f32
    %86 = vector.broadcast %cst_30 : f32 to vector<4x8xf32>
    %87 = arith.addf %86, %85 : vector<4x8xf32>
    %88 = arith.divf %86, %87 : vector<4x8xf32>
    %cst_31 = arith.constant 0.000000e+00 : f32
    %89 = vector.broadcast %cst_31 : f32 to vector<4x8xf32>
    %90 = arith.select %6, %89, %88 : vector<4x8xi1>, vector<4x8xf32>
    %c0_32 = arith.constant 0 : index
    %c0_33 = arith.constant 0 : index
    %91 = vector.load %arg4[%c0_32, %c0_33] : memref<4x8xf32, #tpu.memory_space<vmem>>, vector<4x8xf32>
    tpu.vector_store %arg4[%c0_32, %c0_33], %90 {strides = array<i32>} : memref<4x8xf32, #tpu.memory_space<vmem>>, vector<4x8xf32>,
    return
  }
  func.func @transform_0(%arg0: i32) -> (i32, i32, i32) {
    %c0_i32 = arith.constant 0 : i32
    %c0_i32_0 = arith.constant 0 : i32
    %c0_i32_1 = arith.constant 0 : i32
    return %arg0, %c0_i32, %c0_i32_0 : i32, i32, i32
  }
  func.func @transform_1(%arg0: i32) -> (i32, i32) {
    %c0_i32 = arith.constant 0 : i32
    %c0_i32_0 = arith.constant 0 : i32
    %c0_i32_1 = arith.constant 0 : i32
    return %c0_i32, %c0_i32_0 : i32, i32
  }
  func.func @transform_2(%arg0: i32) -> i32 {
    %c0_i32 = arith.constant 0 : i32
    %c0_i32_0 = arith.constant 0 : i32
    return %c0_i32 : i32
  }
  func.func @transform_3(%arg0: i32) -> (i32, i32) {
    %c0_i32 = arith.constant 0 : i32
    %c0_i32_0 = arith.constant 0 : i32
    return %arg0, %c0_i32 : i32, i32
  }
}

</mosaic_0001>

<bundles_post_ra>
// kernel: tpu_custom_call.1
= control target key start
LH: loop header
LB: loop body
LE: loop exit
PB: predicated region body
PF: predicated region fallthrough
CT: control target
= control target key end

     0   :  { %8 = vsyncpa [#allocation3], 0  ;;  %s910_s0 = inlined_call_operand.hbm [shape: f32[4,8,32], index: 0, kind: input, shape index: {}]   ;;  %s911_s1 = inlined_call_operand.hbm [shape: f32[2,32], index: 1, kind: input, shape index: {}]   ;;  %s912_s2 = inlined_call_operand.vmem [shape: f32[3], index: 2, kind: input, shape index: {}]   ;;  %s913_s3 = inlined_call_operand.hbm [shape: f32[4,8], index: 3, kind: output, shape index: {}]  }
   0x1   :  { %9 = vsyncpa [#allocation7], 0 }
   0x2   :  { %10 = vsyncpa [#allocation5], 0 }
   0x3   :  { %11 = vsyncpa [#allocation4], 0  ;;  %s657_s12 = smov [#allocation2]  }
   0x4   :  { %s17_s13 = sshll.u32 %s657_s12, 4  ;;  %s18_s13 = int_to_ptr.vmem [resolvable:$true] %s17_s13 }
   0x5   :  { %s585_s14 = scalar_lea.vmem %s18_s13, 512  ;;  %p590_p1 = scmp.lt.s32.totalorder %s18_s13, %s18_s13 }
   0x6   :  { %p586_p0 = scmp.ne.s32.totalorder %s18_s13, %s585_s14  ;;  %p591_p2 = scmp.lt.s32.totalorder %s585_s14, %s585_s14 }
   0x8   :  { %p592_p3 = por %p591_p2, %p590_p1 }
   0xa   :  { %p593_p4 = pnand %p592_p3, %p586_p0 }
   0xc   :  { %596 = shalt.err (!%p593_p4)
}
   0xd   :  { %s658_s15 = smov 128   ;;  %s659_s16 = smov 8  }
   0xe   :  { %23 = dma.hbm_to_vmem [thread:$0]  %s910_s0, 512, %s18_s13, [#allocation3], %s658_s15, %s658_s15, %s659_s16  }
   0xf   :  { %s660_s19 = smov [#allocation6]   ;;  %s40_s23 = sshll.u32 %s912_s2, 4  ;;  %s41_s23 = int_to_ptr.vmem [resolvable:$true] %s40_s23 }
  0x10   :  { %s30_s20 = sshll.u32 %s660_s19, 4  ;;  %s31_s20 = int_to_ptr.vmem [resolvable:$true] %s30_s20 }
  0x11   :  { %s605_s24 = scalar_lea.vmem %s31_s20, 32  ;;  %p610_p6 = scmp.lt.s32.totalorder %s31_s20, %s31_s20 }
  0x12   :  { %p606_p5 = scmp.ne.s32.totalorder %s31_s20, %s605_s24  ;;  %p611_p7 = scmp.lt.s32.totalorder %s605_s24, %s605_s24 }
  0x14   :  { %p612_p8 = por %p611_p7, %p610_p6 }
  0x16   :  { %p613_p9 = pnand %p612_p8, %p606_p5 }
  0x18   :  { %616 = shalt.err (!%p613_p9)
}
  0x19   :  { %33 = dma.hbm_to_vmem [thread:$0]  %s911_s1, 32, %s31_s20, [#allocation7]  }
  0x1a   :  { %s617_s0 = scalar_lea.vmem %s41_s23, 16  ;;  %p622_p11 = scmp.lt.s32.totalorder %s41_s23, %s41_s23 }
  0x1b   :  { %p618_p10 = scmp.ne.s32.totalorder %s41_s23, %s617_s0  ;;  %p623_p12 = scmp.lt.s32.totalorder %s617_s0, %s617_s0 }
  0x1d   :  { %p624_p13 = por %p623_p12, %p622_p11 }
  0x1f   :  { %p625_p0 = pnand %p624_p13, %p618_p10 }
  0x21   :  { %628 = shalt.err (!%p625_p0)
}
  0x22   :  { %s661_s2 = smov [#allocation8]  }
  0x23   :  { %43 = dma.vmem_to_smem %s41_s23, 16, %s661_s2, [#allocation5]  }
  0x24   :  { %649 = dma.done.wait [#allocation3], 512  }
  0x25   :  { %650 = vsyncadd [#allocation3], 4294966784 }
  0x26   :  { %651 = dma.done.wait [#allocation7], 32  }
  0x27   :  { %652 = vsyncadd [#allocation7], 4294967264 }
  0x28   :  { %653 = dma.done.wait [#allocation5], 16  }
  0x29   :  { %654 = vsyncadd [#allocation5], 4294967280 }
  0x2a   :  { %53 = sfence }
  0x2b   :  { %v694_v0 = vld [vmem:[#allocation2] sm:$0xff]  ;;  %vm74_vm0 = vcmask 261120   ;;  %v696_v1 = vld [vmem:[#allocation2 + $0x8] sm:$0xff]  ;;  %v698_v2 = vld [vmem:[#allocation2 + $0x10] sm:$0xff]  ;;  %v662_v4 = vmov 0.0   ;;  %s157_s1 = sld [smem:[#allocation8]] }
  0x2c   :  { %vm58_vm1 = vcmp.eq.f32.partialorder %v694_v0, -1.0  ;;  %vm59_vm2 = vcmp.eq.f32.partialorder %v696_v1, -1.0  ;;  %vm60_vm3 = vcmp.eq.f32.partialorder %v698_v2, -1.0  ;;  %v717_v8 = vld [vmem:[#allocation2 + $0x18] sm:$0xff]  ;;  %s503_s27 = sld [smem:[#allocation8 + $0x1]]  ;;  %s664_s29 = smov [#allocation9]  }
  0x2d   :  { %v706_v3 = vsel %vm58_vm1, 0.0, %v694_v0  ;;  %v495_v5 = vsel %vm58_vm1, 1.0, %v662_v4  ;;  %v713_v6 = vsel %vm59_vm2, 0.0, %v696_v1  ;;  %v496_v7 = vsel %vm59_vm2, 1.0, %v662_v4  ;;  %s864_s28 = sld [smem:[#allocation8 + $0x2]]  ;;  %s484_s30 = sshll.u32 %s664_s29, 4  ;;  %s485_s30 = int_to_ptr.vmem [resolvable:$true] %s484_s30 }
  0x2e   :  { %v75_v9 = vsel %vm74_vm0, %v495_v5, 0.0  ;;  %v115_v10 = vsel %vm74_vm0, %v706_v3, 0.0  ;;  %v82_v11 = vsel %vm74_vm0, %v496_v7, 0.0  ;;  %v122_v15 = vsel %vm74_vm0, %v713_v6, 0.0  ;;  %s629_s4 = scalar_lea.vmem %s485_s30, 64  ;;  %p634_p2 = scmp.lt.s32.totalorder %s485_s30, %s485_s30 }
  0x2f   :  { %v76_v12 = vrot.slane %v75_v9, 4  ;;  %160 = vadd.xlane.f32.xlu0 %v115_v10  ;;  %v83_v13 = vrot.slane %v82_v11, 4  ;;  %v116_v14 = vrot.slane %v115_v10, 4  ;;  %v497_v16 = vsel %vm60_vm3, 1.0, %v662_v4  ;;  %p630_p1 = scmp.ne.s32.totalorder %s485_s30, %s629_s4  ;;  %p635_p3 = scmp.lt.s32.totalorder %s629_s4, %s629_s4 }
  0x30   :  { %vm61_vm4 = vcmp.eq.f32.partialorder %v717_v8, -1.0  ;;  %v123_v19 = vrot.slane %v122_v15, 4  ;;  %v731_v20 = vsel %vm60_vm3, 0.0, %v698_v2  ;;  %v89_v21 = vsel %vm74_vm0, %v497_v16, 0.0 }
  0x31   :  { %v77_v17 = vadd.f32 %v76_v12, %v75_v9  ;;  %v84_v18 = vadd.f32 %v83_v13, %v82_v11  ;;  %v737_v22 = vsel %vm61_vm4, 0.0, %v717_v8  ;;  %v498_v23 = vsel %vm61_vm4, 1.0, %v662_v4  ;;  %p636_p4 = por %p635_p3, %p634_p2 }
  0x32   :  { %v117_v26 = vadd.f32 %v116_v14, %v115_v10  ;;  %v90_v27 = vrot.slane %v89_v21, 4  ;;  %v129_v28 = vsel %vm74_vm0, %v731_v20, 0.0  ;;  %v96_v29 = vsel %vm74_vm0, %v498_v23, 0.0 }
  0x33   :  { %v78_v24 = vrot.slane %v77_v17, 2  ;;  %v85_v25 = vrot.slane %v84_v18, 2  ;;  %162 = vadd.xlane.f32.xlu0 %v122_v15  ;;  %v124_v32 = vadd.f32 %v123_v19, %v122_v15  ;;  %v136_v33 = vsel %vm74_vm0, %v737_v22, 0.0  ;;  %p637_p5 = pnand %p636_p4, %p630_p1 }
  0x34   :  { %v91_v34 = vadd.f32 %v90_v27, %v89_v21  ;;  %v130_v35 = vrot.slane %v129_v28, 4  ;;  %v97_v36 = vrot.slane %v96_v29, 4  ;;  %v137_v37 = vrot.slane %v136_v33, 4 }
  0x35   :  { %v79_v30 = vadd.f32 %v78_v24, %v77_v17  ;;  %v86_v31 = vadd.f32 %v85_v25, %v84_v18  ;;  %v173_v40 = vmul.f32 %v713_v6, %v713_v6  ;;  %v118_v41 = vrot.slane %v117_v26, 2 }
  0x36   :  { %v92_v42 = vrot.slane %v91_v34, 2  ;;  %v98_v43 = vadd.f32 %v97_v36, %v96_v29  ;;  %v125_v46 = vrot.slane %v124_v32, 2  ;;  %v131_v48 = vadd.f32 %v130_v35, %v129_v28 }
  0x37   :  { %v80_v38 = vrot.slane %v79_v30, 1  ;;  %v87_v39 = vrot.slane %v86_v31, 1  ;;  %164 = vadd.xlane.f32.xlu0 %v129_v28  ;;  %v138_v50 = vadd.f32 %v137_v37, %v136_v33  ;;  %v179_v53 = vsel %vm74_vm0, %v173_v40, 0.0 }
  0x38   :  { %v93_v47 = vadd.f32 %v92_v42, %v91_v34  ;;  %v99_v49 = vrot.slane %v98_v43, 2  ;;  %v172_v54 = vmul.f32 %v706_v3, %v706_v3  ;;  %v119_v55 = vadd.f32 %v118_v41, %v117_v26  ;;  %180 = vadd.xlane.f32.xlu1 %v179_v53  ;;  %v505_v41 = vld [vmem:[#allocation6] ss:$0 sm:$0xff] }
  0x39   :  { %v81_v44 = vadd.f32 %v80_v38, %v79_v30  ;;  %v88_v45 = vadd.f32 %v87_v39, %v86_v31  ;;  %v174_v61 = vmul.f32 %v731_v20, %v731_v20  ;;  %v126_v62 = vadd.f32 %v125_v46, %v124_v32 }
  0x3a   :  { %v94_v56 = vrot.slane %v93_v47, 1  ;;  %v100_v57 = vadd.f32 %v99_v49, %v98_v43  ;;  %v176_v60 = vsel %vm74_vm0, %v172_v54, 0.0  ;;  %v132_v4 = vrot.slane %v131_v48, 2  ;;  %v506_v54 = vld [vmem:[#allocation6 + $0x1] ss:$0 sm:$0xff] }
  0x3b   :  { %v103_v51 = vsub.f32 8.0, %v81_v44  ;;  %v104_v52 = vsub.f32 8.0, %v88_v45  ;;  %166 = vadd.xlane.f32.xlu0 %v136_v33  ;;  %v139_v7 = vrot.slane %v138_v50, 2  ;;  %v182_v11 = vsel %vm74_vm0, %v174_v61, 0.0 }
  0x3c   :  { %v95_v63 = vadd.f32 %v94_v56, %v93_v47  ;;  %v101_v5 = vrot.slane %v100_v57, 1  ;;  %v120_v12 = vrot.slane %v119_v55, 1  ;;  %v127_v13 = vrot.slane %v126_v62, 1 }
  0x3d   :  { %v499_v58 = vadd.f32 -1.0, %v103_v51  ;;  %v500_v59 = vadd.f32 -1.0, %v104_v52  ;;  %v133_v15 = vadd.f32 %v132_v4, %v131_v48  ;;  %v140_v18 = vadd.f32 %v139_v7, %v138_v50 }
  0x3e   :  { %v105_v9 = vsub.f32 8.0, %v95_v63  ;;  %v102_v10 = vadd.f32 %v101_v5, %v100_v57  ;;  %v121_v19 = vadd.f32 %v120_v12, %v119_v55  ;;  %v128_v21 = vadd.f32 %v127_v13, %v126_v62 }
  0x3f   :  { %177 = vadd.xlane.f32.xlu0 %v176_v60  ;;  %521 = vrcp.f32 %v499_v58  ;;  %v134_v23 = vrot.slane %v133_v15, 1  ;;  %v141_v24 = vrot.slane %v140_v18, 1  ;;  %v175_v35 = vmul.f32 %v737_v22, %v737_v22 }
  0x40   :  { %523 = vrcp.f32 %v500_v59  ;;  %v501_v14 = vadd.f32 -1.0, %v105_v9  ;;  %v106_v16 = vsub.f32 8.0, %v102_v10  ;;  %v143_v25 = vsub.f32 %v121_v19, %v706_v3 }
  0x41   :  { %v135_v26 = vadd.f32 %v134_v23, %v133_v15  ;;  %v144_v27 = vsub.f32 %v128_v21, %v713_v6  ;;  %v142_v29 = vadd.f32 %v141_v24, %v140_v18  ;;  %v185_v46 = vsel %vm74_vm0, %v175_v35, 0.0 }
  0x42   :  { %v502_v17 = vadd.f32 -1.0, %v106_v16  ;;  %525 = vrcp.f32 %v501_v14  ;;  %v248_v48 = vmul.f32 %v505_v41, %v706_v3  ;;  %v250_v53 = vmul.f32 %v505_v41, %v731_v20 }
  0x43   :  { %183 = vadd.xlane.f32.xlu0 %v182_v11  ;;  %v145_v33 = vsub.f32 %v135_v26, %v731_v20  ;;  %v146_v39 = vsub.f32 %v142_v29, %v737_v22  ;;  %v251_v61 = vmul.f32 %v505_v41, %v737_v22  ;;  %v249_v5 = vmul.f32 %v505_v41, %v713_v6 }
  0x44   :  { %527 = vrcp.f32 %v502_v17  ;;  %v252_v52 = vsel %vm74_vm0, %v248_v48, 0.0  ;;  %v258_v3 = vsel %vm74_vm0, %v250_v53, 0.0  ;;  %v663_v14 = vmov 0  }
  0x45   :  { %v261_v63 = vsel %vm74_vm0, %v251_v61, 0.0  ;;  %v255_v7 = vsel %vm74_vm0, %v249_v5, 0.0  ;;  %519 = vset.pattern.permute.xlu0 %v663_v14  ;;  %520 = vset.pattern.permute.xlu1 %v663_v14 }
  0x4c   :  { %v522_v28 = vpop.eup %521 }
  0x4d   :  { %v524_v30 = vpop.eup %523  ;;  %v147_v31 = vmul.f32 %v522_v28, %v143_v25 }
  0x4e   :  { %v148_v32 = vmul.f32 %v524_v30, %v144_v27 }
  0x4f   :  { %v151_v34 = vsel %vm58_vm1, 0.0, %v147_v31  ;;  %v526_v40 = vpop.eup %525 }
  0x50   :  { %v277_v36 = vsel %vm74_vm0, %v151_v34, 0.0  ;;  %v293_v37 = vmul.f32 %v151_v34, %v151_v34  ;;  %v152_v38 = vsel %vm59_vm2, 0.0, %v148_v32  ;;  %v149_v44 = vmul.f32 %v526_v40, %v145_v33 }
  0x51   :  { %278 = vadd.xlane.f32.xlu1 %v277_v36  ;;  %v280_v43 = vsel %vm74_vm0, %v152_v38, 0.0  ;;  %v528_v45 = vpop.eup %527  ;;  %v294_v56 = vmul.f32 %v152_v38, %v152_v38  ;;  %v369_v57 = vmul.f32 %v506_v54, %v151_v34  ;;  %v370_v9 = vmul.f32 %v506_v54, %v152_v38 }
  0x52   :  { %v297_v42 = vsel %vm74_vm0, %v293_v37, 0.0  ;;  %v153_v47 = vsel %vm60_vm3, 0.0, %v149_v44  ;;  %v150_v49 = vmul.f32 %v528_v45, %v146_v39 }
  0x53   :  { %298 = vadd.xlane.f32.xlu0 %v297_v42  ;;  %v283_v50 = vsel %vm74_vm0, %v153_v47, 0.0  ;;  %v300_v58 = vsel %vm74_vm0, %v294_v56, 0.0  ;;  %v295_v59 = vmul.f32 %v153_v47, %v153_v47  ;;  %v373_v60 = vsel %vm74_vm0, %v369_v57, 0.0 }
  0x54   :  { %v154_v51 = vsel %vm61_vm4, 0.0, %v150_v49  ;;  %v376_v22 = vsel %vm74_vm0, %v370_v9, 0.0  ;;  %v371_v10 = vmul.f32 %v506_v54, %v153_v47 }
  0x55   :  { %281 = vadd.xlane.f32.xlu1 %v280_v43  ;;  %v286_v55 = vsel %vm74_vm0, %v154_v51, 0.0  ;;  %v303_v20 = vsel %vm74_vm0, %v295_v59, 0.0  ;;  %v296_v62 = vmul.f32 %v154_v51, %v154_v51  ;;  %v372_v12 = vmul.f32 %v506_v54, %v154_v51 }
  0x56   :  { %v379_v11 = vsel %vm74_vm0, %v371_v10, 0.0 }
  0x57   :  { %186 = vadd.xlane.f32.xlu0 %v185_v46  ;;  %v306_v4 = vsel %vm74_vm0, %v296_v62, 0.0  ;;  %v382_v13 = vsel %vm74_vm0, %v372_v12, 0.0 }
  0x59   :  { %284 = vadd.xlane.f32.xlu1 %v283_v50 }
  0x5b   :  { %253 = vadd.xlane.f32.xlu0 %v252_v52 }
  0x5d   :  { %287 = vadd.xlane.f32.xlu1 %v286_v55 }
  0x5f   :  { %259 = vadd.xlane.f32.xlu0 %v258_v3 }
  0x61   :  { %301 = vadd.xlane.f32.xlu1 %v300_v58 }
  0x63   :  { %374 = vadd.xlane.f32.xlu0 %v373_v60 }
  0x65   :  { %304 = vadd.xlane.f32.xlu1 %v303_v20 }
  0x67   :  { %262 = vadd.xlane.f32.xlu0 %v261_v63 }
  0x69   :  { %307 = vadd.xlane.f32.xlu1 %v306_v4 }
  0x6d   :  { %256 = vadd.xlane.f32.xlu1 %v255_v7 }
  0x71   :  { %377 = vadd.xlane.f32.xlu1 %v376_v22 }
  0x75   :  { %380 = vadd.xlane.f32.xlu1 %v379_v11 }
  0x79   :  { %383 = vadd.xlane.f32.xlu1 %v382_v13 }
  0xb8   :  { %v161_v6 = vpop.xlane.xlu0 %160 }
  0xb9   :  { %v790_v18 = vmul.f32 0.03125, %v161_v6 }
  0xbb   :  { %v192_v19 = vmul.f32 1.032258, %v790_v18 }
  0xbc   :  { %v163_v15 = vpop.xlane.xlu0 %162 }
  0xbd   :  { %v196_v23 = vmul.f32 %v192_v19, %v790_v18  ;;  %v794_v25 = vmul.f32 0.03125, %v163_v15 }
  0xbf   :  { %v193_v27 = vmul.f32 1.032258, %v794_v25 }
  0xc0   :  { %v165_v16 = vpop.xlane.xlu0 %164 }
  0xc1   :  { %v797_v28 = vmul.f32 0.03125, %v165_v16  ;;  %v181_v29 = vpop.xlane.xlu1 %180  ;;  %v197_v32 = vmul.f32 %v193_v27, %v794_v25 }
  0xc2   :  { %v189_v31 = vmul.f32 0.032258064, %v181_v29 }
  0xc3   :  { %v194_v34 = vmul.f32 1.032258, %v797_v28 }
  0xc4   :  { %v167_v17 = vpop.xlane.xlu0 %166  ;;  %v201_v38 = vsub.f32 %v189_v31, %v197_v32 }
  0xc5   :  { %v801_v35 = vmul.f32 0.03125, %v167_v17  ;;  %v198_v40 = vmul.f32 %v194_v34, %v797_v28 }
  0xc6   :  { %v809_v47 = vmax.f32 %v201_v38, 0.0 }
  0xc7   :  { %v195_v44 = vmul.f32 1.032258, %v801_v35 }
  0xc8   :  { %v178_v21 = vpop.xlane.xlu0 %177  ;;  %vm217_vm8 = vcmp.eq.f32.partialorder %v809_v47, inf  ;;  %vm219_vm10 = vcmp.eq.f32.partialorder %v809_v47, 0.0 }
  0xc9   :  { %v188_v24 = vmul.f32 0.032258064, %v178_v21  ;;  %v199_v51 = vmul.f32 %v195_v44, %v801_v35 }
  0xcb   :  { %v200_v26 = vsub.f32 %v188_v24, %v196_v23 }
  0xcc   :  { %v184_v33 = vpop.xlane.xlu0 %183 }
  0xcd   :  { %v204_v30 = vmax.f32 %v200_v26, 0.0  ;;  %v190_v41 = vmul.f32 0.032258064, %v184_v33 }
  0xcf   :  { %529 = vrsqrt.f32 %v204_v30  ;;  %v202_v49 = vsub.f32 %v190_v41, %v198_v40  ;;  %vm210_vm5 = vcmp.eq.f32.partialorder %v204_v30, inf  ;;  %v213_v7 = vand.u32 2147483648, %v204_v30 }
  0xd0   :  { %531 = vrsqrt.f32 %v809_v47  ;;  %vm212_vm6 = vcmp.eq.f32.partialorder %v204_v30, 0.0 }
  0xd1   :  { %v815_v56 = vmax.f32 %v202_v49, 0.0  ;;  %v852_v49 = vstv %s157_s1 }
  0xd3   :  { %vm224_vm11 = vcmp.eq.f32.partialorder %v815_v56, inf  ;;  %vm226_vm12 = vcmp.eq.f32.partialorder %v815_v56, 0.0 }
  0xda   :  { %v279_v36 = vpop.xlane.xlu1 %278 }
  0xdb   :  { %v803_v37 = vmul.f32 0.03125, %v279_v36 }
  0xdc   :  { %v299_v39 = vpop.xlane.xlu0 %298  ;;  %v530_v3 = vpop.eup %529 }
  0xdd   :  { %v313_v42 = vmul.f32 1.032258, %v803_v37  ;;  %v309_v43 = vmul.f32 0.032258064, %v299_v39  ;;  %v209_v61 = vmul.f32 %v530_v3, %v204_v30  ;;  %v532_v16 = vpop.eup %531  ;;  %v220_v39 = vand.u32 2147483648, %v809_v47 }
  0xde   :  { %v282_v45 = vpop.xlane.xlu1 %281  ;;  %v216_v29 = vmul.f32 %v532_v16, %v809_v47  ;;  %v265_v3 = vmul.f32 %v852_v49, %v790_v18 }
  0xdf   :  { %v317_v46 = vmul.f32 %v313_v42, %v803_v37  ;;  %v812_v55 = vmul.f32 0.03125, %v282_v45  ;;  %v211_v22 = vsel %vm210_vm5, %v204_v30, %v209_v61 }
  0xe0   :  { %v187_v48 = vpop.xlane.xlu0 %186  ;;  %v214_v6 = vsel %vm212_vm6, %v213_v7, %v211_v22  ;;  %v218_v42 = vsel %vm217_vm8, %v809_v47, %v216_v29 }
  0xe1   :  { %v321_v50 = vsub.f32 %v309_v43, %v317_v46  ;;  %v191_v52 = vmul.f32 0.032258064, %v187_v48  ;;  %v314_v59 = vmul.f32 1.032258, %v812_v55  ;;  %v236_v24 = vadd.f32 1e-06, %v214_v6 }
  0xe2   :  { %v285_v53 = vpop.xlane.xlu1 %284  ;;  %v221_v46 = vsel %vm219_vm10, %v220_v39, %v218_v42  ;;  %v227_v48 = vand.u32 2147483648, %v815_v56 }
  0xe3   :  { %v325_v54 = vmax.f32 %v321_v50, 0.0  ;;  %v203_v57 = vsub.f32 %v191_v52, %v199_v51  ;;  %v818_v60 = vmul.f32 0.03125, %v285_v53  ;;  %v318_v4 = vmul.f32 %v314_v59, %v812_v55 }
  0xe4   :  { %v838_v32 = vpop.xlane.xlu0 %253  ;;  %v857_v52 = vstv %s503_s27  ;;  %v237_v53 = vadd.f32 1e-06, %v221_v46 }
  0xe5   :  { %533 = vrsqrt.f32 %v325_v54  ;;  %v821_v20 = vmax.f32 %v203_v57, 0.0  ;;  %v315_v63 = vmul.f32 1.032258, %v818_v60  ;;  %vm331_vm7 = vcmp.eq.f32.partialorder %v325_v54, inf }
  0xe6   :  { %v288_v58 = vpop.xlane.xlu1 %287  ;;  %535 = vrsqrt.f32 %v815_v56  ;;  %v334_v30 = vand.u32 2147483648, %v325_v54  ;;  %vm333_vm9 = vcmp.eq.f32.partialorder %v325_v54, 0.0  ;;  %v386_v59 = vmul.f32 %v857_v52, %v803_v37 }
  0xe7   :  { %v825_v9 = vmul.f32 0.03125, %v288_v58  ;;  %537 = vrsqrt.f32 %v821_v20  ;;  %v319_v13 = vmul.f32 %v315_v63, %v818_v60  ;;  %vm231_vm14 = vcmp.eq.f32.partialorder %v821_v20, inf }
  0xe8   :  { %v849_v45 = vpop.xlane.xlu0 %259  ;;  %v269_v18 = vsub.f32 %v838_v32, %v265_v3  ;;  %vm233_vm5 = vcmp.eq.f32.partialorder %v821_v20, 0.0  ;;  %v387_v42 = vmul.f32 %v857_v52, %v812_v55 }
  0xe9   :  { %v316_v15 = vmul.f32 1.032258, %v825_v9 }
  0xea   :  { %v302_v62 = vpop.xlane.xlu1 %301 }
  0xeb   :  { %v310_v5 = vmul.f32 0.032258064, %v302_v62  ;;  %v320_v31 = vmul.f32 %v316_v15, %v825_v9 }
  0xed   :  { %v322_v10 = vsub.f32 %v310_v5, %v318_v4  ;;  %v234_v5 = vand.u32 2147483648, %v821_v20 }
  0xee   :  { %v305_v11 = vpop.xlane.xlu1 %304 }
  0xef   :  { %v828_v12 = vmax.f32 %v322_v10, 0.0  ;;  %v311_v14 = vmul.f32 0.032258064, %v305_v11 }
  0xf1   :  { %539 = vrsqrt.f32 %v828_v12  ;;  %v323_v17 = vsub.f32 %v311_v14, %v319_v13  ;;  %vm338_vm13 = vcmp.eq.f32.partialorder %v828_v12, inf  ;;  %v341_v58 = vand.u32 2147483648, %v828_v12 }
  0xf2   :  { %v534_v19 = vpop.eup %533  ;;  %v308_v21 = vpop.xlane.xlu1 %307  ;;  %vm340_vm15 = vcmp.eq.f32.partialorder %v828_v12, 0.0 }
  0xf3   :  { %v330_v23 = vmul.f32 %v534_v19, %v325_v54  ;;  %v833_v26 = vmax.f32 %v323_v17, 0.0  ;;  %v312_v27 = vmul.f32 0.032258064, %v308_v21  ;;  %v536_v34 = vpop.eup %535 }
  0xf4   :  { %v223_v43 = vmul.f32 %v536_v34, %v815_v56  ;;  %v538_v44 = vpop.eup %537 }
  0xf5   :  { %v332_v33 = vsel %vm331_vm7, %v325_v54, %v330_v23  ;;  %541 = vrsqrt.f32 %v833_v26  ;;  %v324_v38 = vsub.f32 %v312_v27, %v320_v31  ;;  %v230_v51 = vmul.f32 %v538_v44, %v821_v20 }
  0xf6   :  { %v335_v36 = vsel %vm333_vm9, %v334_v30, %v332_v33  ;;  %543 = vrcp.f32 %v236_v24  ;;  %v225_v50 = vsel %vm224_vm11, %v815_v56, %v223_v43  ;;  %v375_v56 = vpop.xlane.xlu0 %374  ;;  %vm345_vm0 = vcmp.eq.f32.partialorder %v833_v26, inf  ;;  %v257_v14 = vpop.xlane.xlu1 %256 }
  0xf7   :  { %v357_v40 = vadd.f32 1e-06, %v335_v36  ;;  %v842_v41 = vmax.f32 %v324_v38, 0.0  ;;  %v228_v57 = vsel %vm226_vm12, %v227_v48, %v225_v50  ;;  %v232_v63 = vsel %vm231_vm14, %v821_v20, %v230_v51 }
  0xf8   :  { %v238_v7 = vadd.f32 1e-06, %v228_v57  ;;  %v390_v13 = vsub.f32 %v375_v56, %v386_v59  ;;  %v348_v37 = vand.u32 2147483648, %v833_v26  ;;  %vm347_vm6 = vcmp.eq.f32.partialorder %v833_v26, 0.0 }
  0xf9   :  { %545 = vrcp.f32 %v357_v40  ;;  %v402_v24 = vstv %s864_s28  ;;  %vm352_vm7 = vcmp.eq.f32.partialorder %v842_v41, inf  ;;  %v355_v20 = vand.u32 2147483648, %v842_v41 }
  0xfa   :  { %547 = vrsqrt.f32 %v842_v41  ;;  %vm354_vm8 = vcmp.eq.f32.partialorder %v842_v41, 0.0  ;;  %v378_v32 = vpop.xlane.xlu1 %377  ;;  %v266_v38 = vmul.f32 %v852_v49, %v794_v25 }
  0xfb   :  { %549 = vrcp.f32 %v237_v53  ;;  %v391_v43 = vsub.f32 %v378_v32, %v387_v42 }
  0xfc   :  { %v270_v40 = vsub.f32 %v257_v14, %v266_v38 }
  0xfe   :  { %v540_v47 = vpop.eup %539  ;;  %v381_v44 = vpop.xlane.xlu1 %380 }
  0xff   :  { %v337_v54 = vmul.f32 %v540_v47, %v828_v12  ;;  %v388_v47 = vmul.f32 %v857_v52, %v818_v60 }
 0x101   :  { %v339_v61 = vsel %vm338_vm13, %v828_v12, %v337_v54  ;;  %v235_v12 = vsel %vm233_vm5, %v234_v5, %v232_v63  ;;  %v392_v54 = vsub.f32 %v381_v44, %v388_v47 }
 0x102   :  { %v542_v62 = vpop.eup %541  ;;  %v342_v4 = vsel %vm340_vm15, %v341_v58, %v339_v61  ;;  %v239_v27 = vadd.f32 1e-06, %v235_v12  ;;  %v263_v58 = vpop.xlane.xlu0 %262  ;;  %v268_v61 = vmul.f32 %v852_v49, %v801_v35 }
 0x103   :  { %v344_v22 = vmul.f32 %v542_v62, %v833_v26  ;;  %v358_v10 = vadd.f32 1e-06, %v342_v4  ;;  %v544_v11 = vpop.eup %543  ;;  %v384_v59 = vpop.xlane.xlu1 %383 }
 0x104   :  { %v273_v19 = vmul.f32 %v544_v11, %v269_v18  ;;  %v272_v63 = vsub.f32 %v263_v58, %v268_v61 }
 0x105   :  { %551 = vrcp.f32 %v358_v10  ;;  %v346_v6 = vsel %vm345_vm0, %v833_v26, %v344_v22 }
 0x106   :  { %v546_v15 = vpop.eup %545  ;;  %v349_v16 = vsel %vm347_vm6, %v348_v37, %v346_v6  ;;  %553 = vrcp.f32 %v238_v7 }
 0x107   :  { %v548_v17 = vpop.eup %547  ;;  %v394_v21 = vmul.f32 %v546_v15, %v390_v13  ;;  %v359_v23 = vadd.f32 1e-06, %v349_v16 }
 0x108   :  { %v351_v29 = vmul.f32 %v548_v17, %v842_v41  ;;  %v550_v39 = vpop.eup %549 }
 0x109   :  { %v398_v30 = vadd.f32 %v394_v21, %v273_v19  ;;  %555 = vrcp.f32 %v359_v23  ;;  %v274_v48 = vmul.f32 %v550_v39, %v270_v40 }
 0x10a   :  { %v353_v31 = vsel %vm352_vm7, %v842_v41, %v351_v29  ;;  %557 = vrcp.f32 %v239_v27  ;;  %v267_v41 = vmul.f32 %v852_v49, %v797_v28  ;;  %v389_v28 = vmul.f32 %v857_v52, %v825_v9 }
 0x10b   :  { %v403_v26 = vadd.f32 %v402_v24, %v398_v30  ;;  %v356_v33 = vsel %vm354_vm8, %v355_v20, %v353_v31  ;;  %v451_v29 = vlaneseq }
 0x10c   :  { %v360_v34 = vadd.f32 1e-06, %v356_v33  ;;  %v271_v25 = vsub.f32 %v849_v45, %v267_v41  ;;  %v393_v4 = vsub.f32 %v384_v59, %v389_v28 }
 0x10d   :  { %v507_v36 = vmul.f32 -1.442695, %v403_v26  ;;  %v452_v30 = vand.u32 127, %v451_v29  ;;  %v454_v20 = vshrl.u32 %v451_v29, 7 }
 0x10e   :  { %559 = vrcp.f32 %v360_v34 }
 0x10f   :  { %561 = vpow2.f32 %v507_v36  ;;  %v455_v26 = vsub.s32 %v452_v30, %v454_v20 }
 0x112   :  { %v552_v46 = vpop.eup %551 }
 0x113   :  { %v395_v50 = vmul.f32 %v552_v46, %v391_v43  ;;  %v554_v51 = vpop.eup %553 }
 0x114   :  { %v275_v57 = vmul.f32 %v554_v51, %v271_v25 }
 0x115   :  { %v399_v53 = vadd.f32 %v395_v50, %v274_v48 }
 0x116   :  { %v556_v3 = vpop.eup %555 }
 0x117   :  { %v404_v55 = vadd.f32 %v402_v24, %v399_v53  ;;  %v396_v56 = vmul.f32 %v556_v3, %v392_v54  ;;  %v558_v62 = vpop.eup %557 }
 0x118   :  { %v276_v22 = vmul.f32 %v558_v62, %v272_v63 }
 0x119   :  { %v508_v18 = vmul.f32 -1.442695, %v404_v55  ;;  %v400_v60 = vadd.f32 %v396_v56, %v275_v57 }
 0x11b   :  { %v560_v45 = vpop.eup %559  ;;  %563 = vpow2.f32 %v508_v18  ;;  %v405_v5 = vadd.f32 %v402_v24, %v400_v60 }
 0x11c   :  { %v562_v7 = vpop.eup %561  ;;  %v397_v10 = vmul.f32 %v560_v45, %v393_v4 }
 0x11d   :  { %v419_v11 = vadd.f32 1.0, %v562_v7  ;;  %v509_v13 = vmul.f32 -1.442695, %v405_v5 }
 0x11e   :  { %v401_v37 = vadd.f32 %v397_v10, %v276_v22 }
 0x11f   :  { %565 = vrcp.f32 %v419_v11 }
 0x120   :  { %567 = vpow2.f32 %v509_v13  ;;  %v406_v35 = vadd.f32 %v402_v24, %v401_v37 }
 0x122   :  { %v510_v49 = vmul.f32 -1.442695, %v406_v35 }
 0x124   :  { %569 = vpow2.f32 %v510_v49 }
 0x128   :  { %v564_v9 = vpop.eup %563 }
 0x129   :  { %v420_v52 = vadd.f32 1.0, %v564_v9 }
 0x12b   :  { %571 = vrcp.f32 %v420_v52 }
 0x12c   :  { %v566_v12 = vpop.eup %565 }
 0x12d   :  { %v568_v14 = vpop.eup %567  ;;  %v431_v6 = vsel %vm58_vm1, 0.0, %v566_v12  ;;  %vm469_vm1 = vcmask 1041409  }
 0x12e   :  { %v421_v15 = vadd.f32 1.0, %v568_v14  ;;  %440 = vperm.xlu0 %519, %v431_v6  }
 0x130   :  { %573 = vrcp.f32 %v421_v15 }
 0x131   :  { %v570_v16 = vpop.eup %569 }
 0x132   :  { %v422_v17 = vadd.f32 1.0, %v570_v16 }
 0x134   :  { %575 = vrcp.f32 %v422_v17 }
 0x138   :  { %v572_v19 = vpop.eup %571 }
 0x139   :  { %v432_v21 = vsel %vm59_vm2, 0.0, %v572_v19  ;;  %vm471_vm2 = vcmask 1042434  }
 0x13a   :  { %443 = vperm.xlu1 %520, %v432_v21  }
 0x13d   :  { %v574_v23 = vpop.eup %573 }
 0x13e   :  { %v433_v24 = vsel %vm60_vm3, 0.0, %v574_v23  ;;  %vm473_vm3 = vcmask 1043459  }
 0x13f   :  { %446 = vperm.xlu1 %520, %v433_v24  }
 0x141   :  { %v576_v27 = vpop.eup %575 }
 0x142   :  { %v434_v0 = vsel %vm61_vm4, 0.0, %v576_v27  ;;  %vm476_vm4 = vcmask 60416  }
 0x143   :  { %449 = vperm.xlu1 %520, %v434_v0  }
 0x1a9   :  { %v441_v32 = vpop.permute.xlu0 %440 }
 0x1aa   :  { %v456_v36 = vrot.slane %v441_v32, %v455_v26 }
 0x1b5   :  { %v444_v31 = vpop.permute.xlu1 %443 }
 0x1b6   :  { %v460_v1 = vrot.slane %v444_v31, %v455_v26 }
 0x1b8   :  { %v470_v38 = vsel %vm469_vm1, %v460_v1, %v456_v36 }
 0x1ba   :  { %v447_v33 = vpop.permute.xlu1 %446 }
 0x1bb   :  { %v464_v34 = vrot.slane %v447_v33, %v455_v26 }
 0x1bd   :  { %v472_v39 = vsel %vm471_vm2, %v464_v34, %v470_v38 }
 0x1be   :  { %v450_v2 = vpop.permute.xlu1 %449 }
 0x1bf   :  { %v468_v8 = vrot.slane %v450_v2, %v455_v26 }
 0x1c1   :  { %v474_v40 = vsel %vm473_vm3, %v468_v8, %v472_v39 }
 0x1c2   :  { %477 = vst.msk [vmem:[#allocation9] sm:$0xf] %vm476_vm4, %v474_v40 }
 0x1c3   :  { %640 = shalt.err (!%p637_p5)
}
 0x1c4   :  { %487 = dma.vmem_to_hbm [thread:$0]  %s485_s30, 64, %s913_s3, [#allocation4]  }
 0x1c5   :  { %655 = dma.done.wait [#allocation4], 64  }
 0x1c6   :  { %656 = vsyncadd [#allocation4], 4294967232 }
 0x1c7   :  { %491 = vsyncpa [#allocation3], 1 }
 0x1c8   :  { %492 = vsyncpa [#allocation7], 1 }
 0x1c9   :  { %493 = vsyncpa [#allocation4], 1 }
 0x1ca   :  { %494 = vsyncpa [#allocation5], 1 }

</bundles_post_ra>
